<compile_context>
chip_gen: v7x
topology: tpu7x:2x2x1
jax: 0.10.0
libtpu: 0.0.40
codegen_flags: <defaults>
</compile_context>

<pallas_src>
import functools

import jax
import jax.numpy as jnp
from jax.experimental import pallas as pl
from jax.experimental.pallas import tpu as pltpu


_LANES = 128
_MAX_TILE_ROWS = 4096                  # (4096, 128) f32 block = 2 MiB / buffer
_VMEM_LIMIT_BYTES = 32 * 1024 * 1024   # headroom on v5e (16 MiB default scoped)


def _ceil_div(a, b):
    return -(-a // b)


def _layout(total):
    """Lane-dense slab layout: (rows, 128) array, (tile_rows, 128) blocks."""
    rows = _ceil_div(total, _LANES)
    # Sublane-aligned tile; Pallas pads/masks the (possibly partial) last block.
    tile_rows = min(_MAX_TILE_ROWS, _ceil_div(rows, 8) * 8)
    grid = (_ceil_div(rows, tile_rows),)
    return rows, tile_rows, grid


def _to_slab(x, rows):
    total = int(x.size)
    padded = rows * _LANES
    flat = x.reshape(-1)
    if padded != total:               # only pad when total % 128 != 0
        flat = jnp.pad(flat, (0, padded - total))
    return flat.reshape(rows, _LANES)


def _from_slab(slab, shape, total):
    flat = slab.reshape(-1)
    if int(flat.size) != total:       # only slice when padding existed
        flat = flat[:total]
    return flat.reshape(shape)


# --------------------------------------------------------------------------
# Kernels
# --------------------------------------------------------------------------
def _gen_apply_kernel(u_ref, x_ref, out_ref, mask_ref, *, p, inv):
    # torch.bernoulli(fill(p)): keep with probability p, then divide by (1-p).
    keep = u_ref[...] < p
    mask_ref[...] = keep.astype(jnp.int8)
    out_ref[...] = x_ref[...] * keep.astype(x_ref.dtype) * inv


def _apply_kernel(x_ref, m_ref, out_ref, *, inv):
    out_ref[...] = x_ref[...] * m_ref[...].astype(x_ref.dtype) * inv


# --------------------------------------------------------------------------
# Wrappers
# --------------------------------------------------------------------------
def fixed_dropout_generate_and_apply(x, p, key):
    """First call: draw the fixed Bernoulli(p) mask and apply it.

    Returns (out, mask_slab) where mask_slab is int8 of shape (rows, 128),
    kept in slab layout so subsequent apply calls read it with no reshaping.
    """
    shape, dtype, total = x.shape, x.dtype, int(x.size)
    rows, tile_rows, grid = _layout(total)
    inv = 1.0 / (1.0 - p + 1e-16)

    x2d = _to_slab(x, rows)
    u2d = jax.random.uniform(key, (rows, _LANES), dtype=jnp.float32)

    spec = pl.BlockSpec((tile_rows, _LANES), lambda i: (i, 0))
    out2d, mask2d = pl.pallas_call(
        functools.partial(_gen_apply_kernel, p=float(p), inv=float(inv)),
        out_shape=(jax.ShapeDtypeStruct((rows, _LANES), dtype),
                   jax.ShapeDtypeStruct((rows, _LANES), jnp.int8)),
        grid_spec=pltpu.PrefetchScalarGridSpec(
            num_scalar_prefetch=0,
            grid=grid,
            in_specs=[spec, spec],
            out_specs=[spec, spec],
        ),
        compiler_params=pltpu.CompilerParams(
            dimension_semantics=("parallel",),        # blocks independent
            vmem_limit_bytes=_VMEM_LIMIT_BYTES,
        ),
    )(u2d, x2d)

    return _from_slab(out2d, shape, total), mask2d


def fixed_dropout_apply(x, mask_slab, p):
    """Subsequent calls (hot path): x * mask * 1/(1-p), mask streamed as int8."""
    shape, dtype, total = x.shape, x.dtype, int(x.size)
    rows, tile_rows, grid = _layout(total)
    assert mask_slab.shape == (rows, _LANES), "mask slab / input size mismatch"
    inv = 1.0 / (1.0 - p + 1e-16)

    x2d = _to_slab(x, rows)

    spec = pl.BlockSpec((tile_rows, _LANES), lambda i: (i, 0))
    out2d = pl.pallas_call(
        functools.partial(_apply_kernel, inv=float(inv)),
        out_shape=jax.ShapeDtypeStruct((rows, _LANES), dtype),
        grid_spec=pltpu.PrefetchScalarGridSpec(
            num_scalar_prefetch=0,
            grid=grid,
            in_specs=[spec, spec],
            out_specs=spec,
        ),
        compiler_params=pltpu.CompilerParams(
            dimension_semantics=("parallel",),        # shards across TCs on v7x
            vmem_limit_bytes=_VMEM_LIMIT_BYTES,
        ),
    )(x2d, mask_slab)

    return _from_slab(out2d, shape, total)


class FixedDropout:
    """JAX/Pallas port of the reference FixedDropout module (torch.Tensor path)."""

    def __init__(self, p=0.5):
        if p < 0.0 or p > 1.0:
            raise ValueError(
                "dropout probability has to be between 0 and 1, but got {}".format(p))
        self.p = float(p)
        self.mask = None            # int8 slab (rows, 128) — fixed until reset
        self._mask_total = None
        self.training = True

    def reset_mask(self):
        self.mask = None
        self._mask_total = None

    def mask_as(self, shape, dtype=jnp.float32):
        """Logical-shape view of the stored fixed mask (for inspection/tests)."""
        assert self.mask is not None
        total = 1
        for d in shape:
            total *= int(d)
        return _from_slab(self.mask, shape, total).astype(dtype)

    def __call__(self, x, key=None):
        if not self.training:
            return x                                  # eval: pass-through, no kernel
        if self.mask is None:
            if key is None:
                key = jax.random.PRNGKey(0)
            out, mask_slab = fixed_dropout_generate_and_apply(x, self.p, key)
            self.mask = mask_slab
            self._mask_total = int(x.size)
            return out
        assert self._mask_total == int(x.size), "mask size mismatch"
        return fixed_dropout_apply(x, self.mask, self.p)


if __name__ == "__main__":
    key = jax.random.PRNGKey(0)
    kx, km, k2 = jax.random.split(key, 3)

    # Small NCHW-shaped input: batch=2, channels=4, spatial=16x16.
    x = jax.random.normal(kx, (2, 4, 16, 16), dtype=jnp.float32)

    drop = FixedDropout(p=0.5)
    drop.training = True

    out1 = jax.block_until_ready(drop(x, key=km))

    # Reconstruct the logical mask for verification.
    mask_logical = drop.mask_as(x.shape, x.dtype)
    assert mask_logical.shape == x.shape and mask_logical.dtype == x.dtype
    assert bool(jnp.all((mask_logical == 0.0) | (mask_logical == 1.0)))

    inv = 1.0 / (1.0 - drop.p + 1e-16)
    assert out1.shape == x.shape and out1.dtype == x.dtype
    assert bool(jnp.allclose(out1, x * mask_logical * inv, rtol=1e-6, atol=1e-6))

    # The fixed mask is reused on subsequent calls (defining property of FixedDropout).
    x2 = jax.random.normal(k2, (2, 4, 16, 16), dtype=jnp.float32)
    out2 = jax.block_until_ready(drop(x2))
    assert bool(jnp.allclose(out2, x2 * mask_logical * inv, rtol=1e-6, atol=1e-6))

    # Eval mode is an identity pass-through with zero HBM traffic.
    drop.training = False
    assert drop(x) is x

    print("KERNEL_OK")
</pallas_src>

<mosaic_0001>
module attributes {stable_mosaic.version = 11 : i64} {
  func.func @_gen_apply_kernel(%arg0: i32, %arg1: memref<16x128xf32, #tpu.memory_space<vmem>>, %arg2: memref<16x128xf32, #tpu.memory_space<vmem>>, %arg3: memref<16x128xf32, #tpu.memory_space<vmem>>, %arg4: memref<16x128xi8, #tpu.memory_space<vmem>>) attributes {dimension_semantics = [#tpu.dimension_semantics<parallel>], iteration_bounds = array<i64: 1>, scalar_prefetch = 0 : i64, scratch_operands = 0 : i64, tpu.core_type = #tpu.core_type<tc>, window_params = [{transform_indices = @transform_0, window_bounds = array<i64: 16, 128>}, {transform_indices = @transform_1, window_bounds = array<i64: 16, 128>}, {transform_indices = @transform_2, window_bounds = array<i64: 16, 128>}, {transform_indices = @transform_3, window_bounds = array<i64: 16, 128>}]} {
    %c0 = arith.constant 0 : index
    %c0_0 = arith.constant 0 : index
    %0 = vector.load %arg1[%c0, %c0_0] : memref<16x128xf32, #tpu.memory_space<vmem>>, vector<16x128xf32>
    %cst = arith.constant 5.000000e-01 : f32
    %1 = vector.broadcast %cst : f32 to vector<16x128xf32>
    %2 = arith.cmpf olt, %0, %1 : vector<16x128xf32>
    %3 = arith.extui %2 : vector<16x128xi1> to vector<16x128xi8>
    %c0_1 = arith.constant 0 : index
    %c0_2 = arith.constant 0 : index
    %4 = vector.load %arg4[%c0_1, %c0_2] : memref<16x128xi8, #tpu.memory_space<vmem>>, vector<16x128xi8>
    tpu.vector_store %arg4[%c0_1, %c0_2], %3 {strides = array<i32>} : memref<16x128xi8, #tpu.memory_space<vmem>>, vector<16x128xi8>,
    %c0_3 = arith.constant 0 : index
    %c0_4 = arith.constant 0 : index
    %5 = vector.load %arg2[%c0_3, %c0_4] : memref<16x128xf32, #tpu.memory_space<vmem>>, vector<16x128xf32>
    %6 = arith.extui %2 : vector<16x128xi1> to vector<16x128xi32>
    %7 = arith.sitofp %6 : vector<16x128xi32> to vector<16x128xf32>
    %8 = arith.mulf %5, %7 : vector<16x128xf32>
    %cst_5 = arith.constant 2.000000e+00 : f32
    %9 = vector.broadcast %cst_5 : f32 to vector<16x128xf32>
    %10 = arith.mulf %8, %9 : vector<16x128xf32>
    %c0_6 = arith.constant 0 : index
    %c0_7 = arith.constant 0 : index
    %11 = vector.load %arg3[%c0_6, %c0_7] : memref<16x128xf32, #tpu.memory_space<vmem>>, vector<16x128xf32>
    tpu.vector_store %arg3[%c0_6, %c0_7], %10 {strides = array<i32>} : memref<16x128xf32, #tpu.memory_space<vmem>>, vector<16x128xf32>,
    return
  }
  func.func @transform_0(%arg0: i32) -> (i32, i32) {
    %c0_i32 = arith.constant 0 : i32
    %c0_i32_0 = arith.constant 0 : i32
    return %arg0, %c0_i32 : i32, i32
  }
  func.func @transform_1(%arg0: i32) -> (i32, i32) {
    %c0_i32 = arith.constant 0 : i32
    %c0_i32_0 = arith.constant 0 : i32
    return %arg0, %c0_i32 : i32, i32
  }
  func.func @transform_2(%arg0: i32) -> (i32, i32) {
    %c0_i32 = arith.constant 0 : i32
    %c0_i32_0 = arith.constant 0 : i32
    return %arg0, %c0_i32 : i32, i32
  }
  func.func @transform_3(%arg0: i32) -> (i32, i32) {
    %c0_i32 = arith.constant 0 : i32
    %c0_i32_0 = arith.constant 0 : i32
    return %arg0, %c0_i32 : i32, i32
  }
}

</mosaic_0001>

<bundles_post_ra>
// kernel: tpu_custom_call.1
= control target key start
LH: loop header
LB: loop body
LE: loop exit
PB: predicated region body
PF: predicated region fallthrough
CT: control target
= control target key end

     0   :  { %9 = vsyncpa [#allocation3], 0  ;;  %s308_s0 = inlined_call_operand.hbm [shape: f32[16,128], index: 0, kind: input, shape index: {}]   ;;  %s309_s1 = inlined_call_operand.hbm [shape: f32[16,128], index: 1, kind: input, shape index: {}]   ;;  %s310_s2 = inlined_call_operand.hbm [shape: f32[16,128], index: 2, kind: output, shape index: {0}]   ;;  %s311_s3 = inlined_call_operand.hbm [shape: s8[16,128], index: 3, kind: output, shape index: {1}]  }
   0x1   :  { %10 = vsyncpa [#allocation6], 0 }
   0x2   :  { %11 = vsyncpa [#allocation4], 0 }
   0x3   :  { %12 = vsyncpa [#allocation9], 0  ;;  %s214_s12 = smov [#allocation2]   ;;  %s118_s16 = scalar_lea.hbm %s308_s0, 256 }
   0x4   :  { %s18_s13 = sshll.u32 %s214_s12, 4  ;;  %p119_p0 = scmp.ne.s32.totalorder %s308_s0, %s118_s16  ;;  %s19_s13 = int_to_ptr.vmem [resolvable:$true] %s18_s13 }
   0x5   :  { %p122_p1 = scmp.lt.u32.totalorder %s118_s16, %s308_s0 }
   0x7   :  { %p124_p2 = pnand %p122_p1, %p119_p0 }
   0x9   :  { %127 = shalt.err (!%p124_p2)
}
   0xa   :  { %s128_s21 = scalar_lea.vmem %s19_s13, 256  ;;  %p133_p4 = scmp.lt.s32.totalorder %s19_s13, %s19_s13 }
   0xb   :  { %p129_p3 = scmp.ne.s32.totalorder %s19_s13, %s128_s21  ;;  %p134_p5 = scmp.lt.s32.totalorder %s128_s21, %s128_s21 }
   0xd   :  { %p135_p6 = por %p134_p5, %p133_p4 }
   0xf   :  { %p136_p7 = pnand %p135_p6, %p129_p3 }
  0x11   :  { %139 = shalt.err (!%p136_p7)
}
  0x12   :  { %s215_s22 = smov 128   ;;  %s216_s23 = smov 8  }
  0x13   :  { %24 = dma.hbm_to_vmem [thread:$0]  %s308_s0, 256, %s19_s13, [#allocation3], %s215_s22, %s215_s22, %s216_s23  }
  0x14   :  { %s217_s26 = smov [#allocation5]   ;;  %s140_s30 = scalar_lea.hbm %s309_s1, 256 }
  0x15   :  { %s30_s27 = sshll.u32 %s217_s26, 4  ;;  %p141_p8 = scmp.ne.s32.totalorder %s309_s1, %s140_s30  ;;  %s31_s27 = int_to_ptr.vmem [resolvable:$true] %s30_s27 }
  0x16   :  { %p144_p9 = scmp.lt.u32.totalorder %s140_s30, %s309_s1 }
  0x18   :  { %p146_p10 = pnand %p144_p9, %p141_p8 }
  0x1a   :  { %149 = shalt.err (!%p146_p10)
}
  0x1b   :  { %s150_s8 = scalar_lea.vmem %s31_s27, 256  ;;  %p155_p12 = scmp.lt.s32.totalorder %s31_s27, %s31_s27 }
  0x1c   :  { %p151_p11 = scmp.ne.s32.totalorder %s31_s27, %s150_s8  ;;  %p156_p13 = scmp.lt.s32.totalorder %s150_s8, %s150_s8 }
  0x1e   :  { %p157_p0 = por %p156_p13, %p155_p12 }
  0x20   :  { %p158_p1 = pnand %p157_p0, %p151_p11 }
  0x22   :  { %161 = shalt.err (!%p158_p1)
}
  0x23   :  { %36 = dma.hbm_to_vmem [thread:$0]  %s309_s1, 256, %s31_s27, [#allocation6], %s215_s22, %s215_s22, %s216_s23  }
  0x24   :  { %206 = dma.done.wait [#allocation3], 256  }
  0x25   :  { %207 = vsyncadd [#allocation3], 4294967040 }
  0x26   :  { %208 = dma.done.wait [#allocation6], 256  }
  0x27   :  { %209 = vsyncadd [#allocation6], 4294967040  ;;  %v45_v0 = vld [vmem:[#allocation2] sm:$0xff]  ;;  %v46_v1 = vld [vmem:[#allocation2 + $0x8] sm:$0xff]  ;;  %v218_v4 = vmov 0.0   ;;  %s219_s10 = smov [#allocation7]  }
  0x28   :  { %v60_v2 = vld [vmem:[#allocation5] sm:$0xff]  ;;  %vm47_vm0 = vcmp.lt.f32.partialorder %v45_v0, 0.5  ;;  %vm48_vm1 = vcmp.lt.f32.partialorder %v46_v1, 0.5  ;;  %v61_v3 = vld [vmem:[#allocation5 + $0x8] sm:$0xff]  ;;  %s77_s11 = sshll.u32 %s219_s10, 4  ;;  %v220_v9 = vmov 0   ;;  %s78_s11 = int_to_ptr.vmem [resolvable:$true] %s77_s11 }
  0x29   :  { %vm49_vm2 = vmpackc.low %vm48_vm1, %vm47_vm0  ;;  %v106_v5 = vsel %vm47_vm0, 1.0, %v218_v4  ;;  %v107_v6 = vsel %vm48_vm1, 1.0, %v218_v4  ;;  %s221_s1 = smov [#allocation8]   ;;  %s162_s13 = scalar_lea.vmem %s78_s11, 256 }
  0x2a   :  { %vm50_vm3 = vmpackc.even %vm49_vm2, %vm49_vm2  ;;  %v66_v7 = vmul.f32 %v106_v5, %v60_v2  ;;  %v67_v8 = vmul.f32 %v107_v6, %v61_v3  ;;  %s89_s12 = sshll.u32 %s221_s1, 4  ;;  %p163_p2 = scmp.ne.s32.totalorder %s78_s11, %s162_s13  ;;  %s274_s12 = int_to_ptr.vmem [resolvable:$true] %s89_s12 }
  0x2b   :  { %v51_v10 = vsel %vm50_vm3, 16843009, %v220_v9  ;;  %p167_p3 = scmp.lt.s32.totalorder %s78_s11, %s78_s11  ;;  %p168_p4 = scmp.lt.s32.totalorder %s162_s13, %s162_s13 }
  0x2c   :  { %v52_v11 = vunpack.c.0.s8 %v51_v10  ;;  %v53_v12 = vunpack.c.1.s8 %v51_v10  ;;  %v68_v13 = vmul.f32 2.0, %v66_v7  ;;  %v69_v14 = vmul.f32 2.0, %v67_v8 }
  0x2d   :  { %p169_p5 = por %p168_p4, %p167_p3 }
  0x2e   :  { %v54_v15 = vpack.c.b16 %v52_v11, %v52_v11  ;;  %v56_v16 = vpack.c.b16 %v53_v12, %v53_v12  ;;  %70 = vst [vmem:[#allocation7] sm:$0xff] %v68_v13  ;;  %71 = vst [vmem:[#allocation7 + $0x8] sm:$0xff] %v69_v14 }
  0x2f   :  { %p170_p6 = pnand %p169_p5, %p163_p2 }
  0x31   :  { %173 = shalt.err (!%p170_p6)
}
  0x32   :  { %s174_s16 = scalar_lea.hbm %s310_s2, 256 }
  0x33   :  { %p175_p7 = scmp.ne.s32.totalorder %s310_s2, %s174_s16  ;;  %p178_p8 = scmp.lt.u32.totalorder %s174_s16, %s310_s2 }
  0x35   :  { %p180_p9 = pnand %p178_p8, %p175_p7 }
  0x37   :  { %183 = shalt.err (!%p180_p9)
}
  0x38   :  { %83 = dma.vmem_to_hbm [thread:$0]  %s78_s11, 256, %s310_s2, [#allocation4], %s215_s22, %s215_s22, %s216_s23   ;;  %v55_v17 = vpack.c.b8 %v54_v15, %v54_v15  ;;  %v57_v18 = vpack.c.b8 %v56_v16, %v56_v16 }
  0x39   :  { %s184_s25 = scalar_lea.vmem %s274_s12, 64  ;;  %p189_p11 = scmp.lt.s32.totalorder %s274_s12, %s274_s12 }
  0x3a   :  { %58 = vst [vmem:[#allocation8] sm:$0x3] %v55_v17  ;;  %59 = vst [vmem:[#allocation8 + $0x2] sm:$0x3] %v57_v18  ;;  %p185_p10 = scmp.ne.s32.totalorder %s274_s12, %s184_s25  ;;  %p190_p12 = scmp.lt.s32.totalorder %s184_s25, %s184_s25 }
  0x3c   :  { %p191_p13 = por %p190_p12, %p189_p11 }
  0x3e   :  { %p192_p0 = pnand %p191_p13, %p185_p10 }
  0x40   :  { %195 = shalt.err (!%p192_p0)
}
  0x41   :  { %s196_s28 = scalar_lea.hbm %s311_s3, 64 }
  0x42   :  { %p197_p1 = scmp.ne.s32.totalorder %s311_s3, %s196_s28  ;;  %p200_p2 = scmp.lt.u32.totalorder %s196_s28, %s311_s3 }
  0x44   :  { %p202_p3 = pnand %p200_p2, %p197_p1 }
  0x46   :  { %205 = shalt.err (!%p202_p3)
}
  0x47   :  { %s222_s23 = smov 32   ;;  %s223_s4 = smov 2  }
  0x48   :  { %95 = dma.vmem_to_hbm [thread:$0]  %s274_s12, 64, %s311_s3, [#allocation9], %s222_s23, %s222_s23, %s223_s4  }
  0x49   :  { %210 = dma.done.wait [#allocation4], 256  }
  0x4a   :  { %211 = vsyncadd [#allocation4], 4294967040 }
  0x4b   :  { %212 = dma.done.wait [#allocation9], 64  }
  0x4c   :  { %213 = vsyncadd [#allocation9], 4294967232 }
  0x4d   :  { %102 = vsyncpa [#allocation3], 1 }
  0x4e   :  { %103 = vsyncpa [#allocation6], 1 }
  0x4f   :  { %104 = vsyncpa [#allocation4], 1 }
  0x50   :  { %105 = vsyncpa [#allocation9], 1 }

</bundles_post_ra>
